<compile_context>
chip_gen: v5e
topology: v5e:2x2
jax: 0.10.0
libtpu: 0.0.40
codegen_flags: <defaults>
</compile_context>

<pallas_src>
import math

import jax
import jax.numpy as jnp
from jax.experimental import pallas as pl
from jax.experimental.pallas import tpu as pltpu


# --------------------------------------------------------------------------- #
# Kernel
# --------------------------------------------------------------------------- #
def lstm_cell_kernel(x_ref, hx_ref, cx_ref, wx_ref, wh_ref, b_ref, h_ref, c_ref):
    x = x_ref[...]
    hx = hx_ref[...]

    def gate_pre(g):
        # Two accumulating MXU dots per gate, f32 accumulation.
        return (jnp.dot(x, wx_ref[g], preferred_element_type=jnp.float32)
                + jnp.dot(hx, wh_ref[g], preferred_element_type=jnp.float32)
                + b_ref[g])

    def sigmoid(v):
        # sigmoid(v) = 0.5*(tanh(0.5 v)+1): one EUP op per element instead of
        # two (exp + reciprocal); the 0.5*/+1 ride otherwise-idle VPU slots.
        return 0.5 * (jnp.tanh(0.5 * v) + 1.0)

    # Gate order matches torch.chunk(z, 4, dim=1): [i, f, c, o].
    i = sigmoid(gate_pre(0))
    f = sigmoid(gate_pre(1))
    c = jnp.tanh(gate_pre(2))
    o = sigmoid(gate_pre(3))

    # Cell-state math stays in f32 regardless of input/operand dtype.
    cx = cx_ref[...].astype(jnp.float32)
    c_n = f * cx + i * c
    h_n = o * jnp.tanh(c_n)

    h_ref[...] = h_n.astype(h_ref.dtype)
    c_ref[...] = c_n.astype(c_ref.dtype)


# --------------------------------------------------------------------------- #
# Parameter re-layout (call ONCE, outside the step loop / jit)
# --------------------------------------------------------------------------- #
def prepare_lstm_params(w_ih, b_ih, w_hh, b_hh, compute_dtype=None):
    """Re-layout nn.Linear-style LSTM params into the kernel's fused layout.

    w_ih:(4H,I) b_ih:(4H,) w_hh:(4H,H) b_hh:(4H,)  ->
      wx:(4,I,H)  wh:(4,H,H)  bias:(4,1,H) (f32, b_ih+b_hh fused)

    Do this once per set of weights (outside jit/scan) so the transpose does
    not burn HBM bandwidth on every step.
    """
    H4, I = w_ih.shape
    H = H4 // 4
    cd = jnp.dtype(compute_dtype) if compute_dtype is not None else w_ih.dtype
    wx = jnp.transpose(w_ih.reshape(4, H, I), (0, 2, 1)).astype(cd)   # (4, I, H)
    wh = jnp.transpose(w_hh.reshape(4, H, H), (0, 2, 1)).astype(cd)   # (4, H, H)
    bias = (b_ih + b_hh).reshape(4, 1, H).astype(jnp.float32)         # (4, 1, H)
    return wx, wh, bias


def _vmem_budget_bytes():
    try:
        cap = int(pltpu.get_tpu_info().vmem_capacity_bytes)   # 128 MiB v5e/v6e, 64 MiB v7x
    except Exception:
        cap = 128 << 20
    return (cap * 3) // 4


# --------------------------------------------------------------------------- #
# Main entry point (pre-fused parameter layout)
# --------------------------------------------------------------------------- #
def my_lstm_cell_fused(x, hx, cx, wx, wh, bias, *, block_b=256, block_h=None):
    """x:(B,I)  hx:(B,H)  cx:(B,H)  wx:(4,I,H)  wh:(4,H,H)  bias:(4,1,H)."""
    B, I = x.shape
    H = hx.shape[1]
    h_dtype = hx.dtype          # hidden state keeps its dtype
    c_dtype = cx.dtype          # cell state keeps its dtype (keep f32 across steps)
    cd = wx.dtype               # matmul-operand dtype (f32 or bf16)

    x = x.astype(cd)
    hx_c = hx.astype(cd)

    budget = _vmem_budget_bytes()

    # ---- hidden-column tile (TH): split only when resident weights are large.
    w_col_bytes = 4 * (I + H) * cd.itemsize            # weight bytes per hidden column
    if block_h is not None:
        th = block_h
    elif H % 128 == 0 and w_col_bytes * H > budget // 2:
        th = max(128, ((budget // 2) // w_col_bytes) // 128 * 128)
        th = min(th, H)
        while H % th:                                  # prefer a divisor of H
            th -= 128
    else:
        th = H
    nh = pl.cdiv(H, th)

    # ---- batch tile (TB).
    sub = 16 if cd == jnp.bfloat16 else 8              # bf16 sublane packing is (16,128)
    tb = min(block_b, B)
    if tb != B and tb % sub != 0:
        tb = B
    nb = pl.cdiv(B, tb)
    if nh == 1 and nb == 1 and B >= 2 * sub:
        # >= 2 grid steps so the "parallel" axis can shard over v7x's 2 TCs.
        tb = ((B + 1) // 2 + sub - 1) // sub * sub
        nb = pl.cdiv(B, tb)

    # ---- VMEM budget: resident weights (single-buffered) + streamed tiles
    #      (double-buffered) + f32 gate intermediates.
    f32b = 4
    resident = 4 * (I + H) * th * cd.itemsize + 4 * th * f32b
    streamed = 2 * (tb * (I + H) * cd.itemsize
                    + tb * th * jnp.dtype(c_dtype).itemsize
                    + tb * th * (jnp.dtype(h_dtype).itemsize
                                 + jnp.dtype(c_dtype).itemsize))
    interm = 8 * tb * th * f32b                        # z per gate + gate temporaries
    vmem_limit = min(max(int(1.25 * (resident + streamed + interm)) + (8 << 20),
                         32 << 20), budget)

    resident_spec = dict(pipeline_mode=pl.Buffered(1))  # single-buffer resident operands

    h_n, c_n = pl.pallas_call(
        lstm_cell_kernel,
        out_shape=(jax.ShapeDtypeStruct((B, H), h_dtype),
                   jax.ShapeDtypeStruct((B, H), c_dtype)),
        grid_spec=pltpu.PrefetchScalarGridSpec(
            num_scalar_prefetch=0,
            # h-block axis OUTER, batch axis INNER (fast): every weight byte is
            # DMA'd from HBM exactly once even when nh > 1.
            grid=(nh, nb),
            in_specs=[
                pl.BlockSpec((tb, I), lambda j, i: (i, 0)),            # x tile
                pl.BlockSpec((tb, H), lambda j, i: (i, 0)),            # hx tile (full K)
                pl.BlockSpec((tb, th), lambda j, i: (i, j)),           # cx tile
                pl.BlockSpec((4, I, th), lambda j, i: (0, 0, j), **resident_spec),
                pl.BlockSpec((4, H, th), lambda j, i: (0, 0, j), **resident_spec),
                pl.BlockSpec((4, 1, th), lambda j, i: (0, 0, j), **resident_spec),
            ],
            out_specs=[
                pl.BlockSpec((tb, th), lambda j, i: (i, j)),           # h_n
                pl.BlockSpec((tb, th), lambda j, i: (i, j)),           # c_n
            ],
        ),
        compiler_params=pltpu.CompilerParams(
            dimension_semantics=("parallel", "parallel"),
            vmem_limit_bytes=vmem_limit,
        ),
    )(x, hx_c, cx, wx, wh, bias)
    return h_n, c_n


# --------------------------------------------------------------------------- #
# Compatibility shim matching the original torch parameter layout.
# (For repeated use, call prepare_lstm_params once and use my_lstm_cell_fused.)
# --------------------------------------------------------------------------- #
def my_lstm_cell(x, hx, cx, w_ih, b_ih, w_hh, b_hh, *, compute_dtype=None,
                 block_b=256, block_h=None):
    wx, wh, bias = prepare_lstm_params(w_ih, b_ih, w_hh, b_hh, compute_dtype)
    return my_lstm_cell_fused(x, hx, cx, wx, wh, bias,
                              block_b=block_b, block_h=block_h)


def reference_lstm_cell(x, hx, cx, w_ih, b_ih, w_hh, b_hh):
    z = x @ w_ih.T + b_ih + hx @ w_hh.T + b_hh
    gi, gf, gc, go = jnp.split(z, 4, axis=1)
    i = jax.nn.sigmoid(gi)
    f = jax.nn.sigmoid(gf)
    c = jnp.tanh(gc)
    o = jax.nn.sigmoid(go)
    c_n = f * cx + i * c
    h_n = o * jnp.tanh(c_n)
    return h_n, c_n


if __name__ == "__main__":
    batch = 8
    input_size = 16
    hidden_size = 32

    key = jax.random.PRNGKey(0)
    k = jax.random.split(key, 7)

    # Params mimicking nn.Linear default init: U(-1/sqrt(fan_in), +).
    bound_ih = 1.0 / math.sqrt(input_size)
    bound_hh = 1.0 / math.sqrt(hidden_size)
    w_ih = jax.random.uniform(k[0], (4 * hidden_size, input_size),
                              jnp.float32, -bound_ih, bound_ih)
    b_ih = jax.random.uniform(k[1], (4 * hidden_size,),
                              jnp.float32, -bound_ih, bound_ih)
    w_hh = jax.random.uniform(k[2], (4 * hidden_size, hidden_size),
                              jnp.float32, -bound_hh, bound_hh)
    b_hh = jax.random.uniform(k[3], (4 * hidden_size,),
                              jnp.float32, -bound_hh, bound_hh)

    x = jax.random.normal(k[4], (batch, input_size), jnp.float32)
    hx = jax.random.normal(k[5], (batch, hidden_size), jnp.float32)
    cx = jax.random.normal(k[6], (batch, hidden_size), jnp.float32)

    h_ref, c_ref = reference_lstm_cell(x, hx, cx, w_ih, b_ih, w_hh, b_hh)

    # Recommended path: re-layout weights ONCE, jit only the fused step.
    wx, wh, bias = prepare_lstm_params(w_ih, b_ih, w_hh, b_hh)
    h_n, c_n = jax.jit(my_lstm_cell_fused)(x, hx, cx, wx, wh, bias)
    jax.block_until_ready((h_n, c_n))
    assert jnp.allclose(h_n, h_ref, atol=1e-5, rtol=1e-5)
    assert jnp.allclose(c_n, c_ref, atol=1e-5, rtol=1e-5)

    # Compatibility shim (original torch-style parameter layout).
    h_s, c_s = jax.jit(my_lstm_cell)(x, hx, cx, w_ih, b_ih, w_hh, b_hh)
    jax.block_until_ready((h_s, c_s))
    assert jnp.allclose(h_s, h_ref, atol=1e-5, rtol=1e-5)
    assert jnp.allclose(c_s, c_ref, atol=1e-5, rtol=1e-5)

    # bf16 matmul-operand path (half the weight HBM bytes; f32 accumulation and
    # f32 cell-state math preserved) -> loose tolerance only.
    wx_b, wh_b, bias_b = prepare_lstm_params(w_ih, b_ih, w_hh, b_hh,
                                             compute_dtype=jnp.bfloat16)
    h_b, c_b = jax.jit(my_lstm_cell_fused)(x, hx, cx, wx_b, wh_b, bias_b)
    jax.block_until_ready((h_b, c_b))
    assert jnp.allclose(h_b, h_ref, atol=5e-2, rtol=5e-2)
    assert jnp.allclose(c_b, c_ref, atol=5e-2, rtol=5e-2)

    print("KERNEL_OK")
</pallas_src>

<mosaic_0001>
module attributes {stable_mosaic.version = 11 : i64} {
  func.func @lstm_cell_kernel(%arg0: i32, %arg1: i32, %arg2: memref<8x16xf32, #tpu.memory_space<vmem>>, %arg3: memref<8x32xf32, #tpu.memory_space<vmem>>, %arg4: memref<8x32xf32, #tpu.memory_space<vmem>>, %arg5: memref<4x16x32xf32, #tpu.memory_space<vmem>>, %arg6: memref<4x32x32xf32, #tpu.memory_space<vmem>>, %arg7: memref<4x1x32xf32, #tpu.memory_space<vmem>>, %arg8: memref<8x32xf32, #tpu.memory_space<vmem>>, %arg9: memref<8x32xf32, #tpu.memory_space<vmem>>) attributes {dimension_semantics = [#tpu.dimension_semantics<parallel>, #tpu.dimension_semantics<parallel>], iteration_bounds = array<i64: 1, 1>, scalar_prefetch = 0 : i64, scratch_operands = 0 : i64, tpu.core_type = #tpu.core_type<tc>, window_params = [{transform_indices = @transform_0, window_bounds = array<i64: 8, 16>}, {transform_indices = @transform_1, window_bounds = array<i64: 8, 32>}, {transform_indices = @transform_2, window_bounds = array<i64: 8, 32>}, {pipeline_mode = #tpu.pipeline_mode<synchronous>, transform_indices = @transform_3, window_bounds = array<i64: 4, 16, 32>}, {pipeline_mode = #tpu.pipeline_mode<synchronous>, transform_indices = @transform_4, window_bounds = array<i64: 4, 32, 32>}, {pipeline_mode = #tpu.pipeline_mode<synchronous>, transform_indices = @transform_5, window_bounds = array<i64: 4, 1, 32>}, {transform_indices = @transform_6, window_bounds = array<i64: 8, 32>}, {transform_indices = @transform_7, window_bounds = array<i64: 8, 32>}]} {
    %c0 = arith.constant 0 : index
    %c0_0 = arith.constant 0 : index
    %0 = vector.load %arg2[%c0, %c0_0] : memref<8x16xf32, #tpu.memory_space<vmem>>, vector<8x16xf32>
    %c0_1 = arith.constant 0 : index
    %c0_2 = arith.constant 0 : index
    %1 = vector.load %arg3[%c0_1, %c0_2] : memref<8x32xf32, #tpu.memory_space<vmem>>, vector<8x32xf32>
    %c0_3 = arith.constant 0 : index
    %c0_4 = arith.constant 0 : index
    %c0_5 = arith.constant 0 : index
    %2 = vector.load %arg5[%c0_3, %c0_4, %c0_5] : memref<4x16x32xf32, #tpu.memory_space<vmem>>, vector<1x16x32xf32>
    %3 = vector.shape_cast %2 : vector<1x16x32xf32> to vector<16x32xf32>
    %cst = arith.constant dense<0.000000e+00> : vector<8x32xf32>
    %4 = tpu.matmul %0, %3, %cst {dimension_numbers = #tpu.dot_dimension_numbers<[1], [0], [0], [1], [0, 0, 1, 1], [], []>} : vector<8x16xf32>, vector<16x32xf32>, vector<8x32xf32> -> vector<8x32xf32>
    %c0_6 = arith.constant 0 : index
    %c0_7 = arith.constant 0 : index
    %c0_8 = arith.constant 0 : index
    %5 = vector.load %arg6[%c0_6, %c0_7, %c0_8] : memref<4x32x32xf32, #tpu.memory_space<vmem>>, vector<1x32x32xf32>
    %6 = vector.shape_cast %5 : vector<1x32x32xf32> to vector<32x32xf32>
    %cst_9 = arith.constant dense<0.000000e+00> : vector<8x32xf32>
    %7 = tpu.matmul %1, %6, %cst_9 {dimension_numbers = #tpu.dot_dimension_numbers<[1], [0], [0], [1], [0, 0, 1, 1], [], []>} : vector<8x32xf32>, vector<32x32xf32>, vector<8x32xf32> -> vector<8x32xf32>
    %8 = arith.addf %4, %7 : vector<8x32xf32>
    %c0_10 = arith.constant 0 : index
    %c0_11 = arith.constant 0 : index
    %c0_12 = arith.constant 0 : index
    %9 = vector.load %arg7[%c0_10, %c0_11, %c0_12] : memref<4x1x32xf32, #tpu.memory_space<vmem>>, vector<1x1x32xf32>
    %10 = vector.shape_cast %9 : vector<1x1x32xf32> to vector<1x32xf32>
    %11 = vector.broadcast %10 : vector<1x32xf32> to vector<8x32xf32>
    %12 = arith.addf %8, %11 : vector<8x32xf32>
    %cst_13 = arith.constant 5.000000e-01 : f32
    %13 = vector.broadcast %cst_13 : f32 to vector<8x32xf32>
    %14 = arith.mulf %13, %12 : vector<8x32xf32>
    %15 = math.tanh %14 : vector<8x32xf32>
    %cst_14 = arith.constant 1.000000e+00 : f32
    %16 = vector.broadcast %cst_14 : f32 to vector<8x32xf32>
    %17 = arith.addf %15, %16 : vector<8x32xf32>
    %cst_15 = arith.constant 5.000000e-01 : f32
    %18 = vector.broadcast %cst_15 : f32 to vector<8x32xf32>
    %19 = arith.mulf %18, %17 : vector<8x32xf32>
    %c1 = arith.constant 1 : index
    %c0_16 = arith.constant 0 : index
    %c0_17 = arith.constant 0 : index
    %20 = vector.load %arg5[%c1, %c0_16, %c0_17] : memref<4x16x32xf32, #tpu.memory_space<vmem>>, vector<1x16x32xf32>
    %21 = vector.shape_cast %20 : vector<1x16x32xf32> to vector<16x32xf32>
    %cst_18 = arith.constant dense<0.000000e+00> : vector<8x32xf32>
    %22 = tpu.matmul %0, %21, %cst_18 {dimension_numbers = #tpu.dot_dimension_numbers<[1], [0], [0], [1], [0, 0, 1, 1], [], []>} : vector<8x16xf32>, vector<16x32xf32>, vector<8x32xf32> -> vector<8x32xf32>
    %c1_19 = arith.constant 1 : index
    %c0_20 = arith.constant 0 : index
    %c0_21 = arith.constant 0 : index
    %23 = vector.load %arg6[%c1_19, %c0_20, %c0_21] : memref<4x32x32xf32, #tpu.memory_space<vmem>>, vector<1x32x32xf32>
    %24 = vector.shape_cast %23 : vector<1x32x32xf32> to vector<32x32xf32>
    %cst_22 = arith.constant dense<0.000000e+00> : vector<8x32xf32>
    %25 = tpu.matmul %1, %24, %cst_22 {dimension_numbers = #tpu.dot_dimension_numbers<[1], [0], [0], [1], [0, 0, 1, 1], [], []>} : vector<8x32xf32>, vector<32x32xf32>, vector<8x32xf32> -> vector<8x32xf32>
    %26 = arith.addf %22, %25 : vector<8x32xf32>
    %c1_23 = arith.constant 1 : index
    %c0_24 = arith.constant 0 : index
    %c0_25 = arith.constant 0 : index
    %27 = vector.load %arg7[%c1_23, %c0_24, %c0_25] : memref<4x1x32xf32, #tpu.memory_space<vmem>>, vector<1x1x32xf32>
    %28 = vector.shape_cast %27 : vector<1x1x32xf32> to vector<1x32xf32>
    %29 = vector.broadcast %28 : vector<1x32xf32> to vector<8x32xf32>
    %30 = arith.addf %26, %29 : vector<8x32xf32>
    %cst_26 = arith.constant 5.000000e-01 : f32
    %31 = vector.broadcast %cst_26 : f32 to vector<8x32xf32>
    %32 = arith.mulf %31, %30 : vector<8x32xf32>
    %33 = math.tanh %32 : vector<8x32xf32>
    %cst_27 = arith.constant 1.000000e+00 : f32
    %34 = vector.broadcast %cst_27 : f32 to vector<8x32xf32>
    %35 = arith.addf %33, %34 : vector<8x32xf32>
    %cst_28 = arith.constant 5.000000e-01 : f32
    %36 = vector.broadcast %cst_28 : f32 to vector<8x32xf32>
    %37 = arith.mulf %36, %35 : vector<8x32xf32>
    %c2 = arith.constant 2 : index
    %c0_29 = arith.constant 0 : index
    %c0_30 = arith.constant 0 : index
    %38 = vector.load %arg5[%c2, %c0_29, %c0_30] : memref<4x16x32xf32, #tpu.memory_space<vmem>>, vector<1x16x32xf32>
    %39 = vector.shape_cast %38 : vector<1x16x32xf32> to vector<16x32xf32>
    %cst_31 = arith.constant dense<0.000000e+00> : vector<8x32xf32>
    %40 = tpu.matmul %0, %39, %cst_31 {dimension_numbers = #tpu.dot_dimension_numbers<[1], [0], [0], [1], [0, 0, 1, 1], [], []>} : vector<8x16xf32>, vector<16x32xf32>, vector<8x32xf32> -> vector<8x32xf32>
    %c2_32 = arith.constant 2 : index
    %c0_33 = arith.constant 0 : index
    %c0_34 = arith.constant 0 : index
    %41 = vector.load %arg6[%c2_32, %c0_33, %c0_34] : memref<4x32x32xf32, #tpu.memory_space<vmem>>, vector<1x32x32xf32>
    %42 = vector.shape_cast %41 : vector<1x32x32xf32> to vector<32x32xf32>
    %cst_35 = arith.constant dense<0.000000e+00> : vector<8x32xf32>
    %43 = tpu.matmul %1, %42, %cst_35 {dimension_numbers = #tpu.dot_dimension_numbers<[1], [0], [0], [1], [0, 0, 1, 1], [], []>} : vector<8x32xf32>, vector<32x32xf32>, vector<8x32xf32> -> vector<8x32xf32>
    %44 = arith.addf %40, %43 : vector<8x32xf32>
    %c2_36 = arith.constant 2 : index
    %c0_37 = arith.constant 0 : index
    %c0_38 = arith.constant 0 : index
    %45 = vector.load %arg7[%c2_36, %c0_37, %c0_38] : memref<4x1x32xf32, #tpu.memory_space<vmem>>, vector<1x1x32xf32>
    %46 = vector.shape_cast %45 : vector<1x1x32xf32> to vector<1x32xf32>
    %47 = vector.broadcast %46 : vector<1x32xf32> to vector<8x32xf32>
    %48 = arith.addf %44, %47 : vector<8x32xf32>
    %49 = math.tanh %48 : vector<8x32xf32>
    %c3 = arith.constant 3 : index
    %c0_39 = arith.constant 0 : index
    %c0_40 = arith.constant 0 : index
    %50 = vector.load %arg5[%c3, %c0_39, %c0_40] : memref<4x16x32xf32, #tpu.memory_space<vmem>>, vector<1x16x32xf32>
    %51 = vector.shape_cast %50 : vector<1x16x32xf32> to vector<16x32xf32>
    %cst_41 = arith.constant dense<0.000000e+00> : vector<8x32xf32>
    %52 = tpu.matmul %0, %51, %cst_41 {dimension_numbers = #tpu.dot_dimension_numbers<[1], [0], [0], [1], [0, 0, 1, 1], [], []>} : vector<8x16xf32>, vector<16x32xf32>, vector<8x32xf32> -> vector<8x32xf32>
    %c3_42 = arith.constant 3 : index
    %c0_43 = arith.constant 0 : index
    %c0_44 = arith.constant 0 : index
    %53 = vector.load %arg6[%c3_42, %c0_43, %c0_44] : memref<4x32x32xf32, #tpu.memory_space<vmem>>, vector<1x32x32xf32>
    %54 = vector.shape_cast %53 : vector<1x32x32xf32> to vector<32x32xf32>
    %cst_45 = arith.constant dense<0.000000e+00> : vector<8x32xf32>
    %55 = tpu.matmul %1, %54, %cst_45 {dimension_numbers = #tpu.dot_dimension_numbers<[1], [0], [0], [1], [0, 0, 1, 1], [], []>} : vector<8x32xf32>, vector<32x32xf32>, vector<8x32xf32> -> vector<8x32xf32>
    %56 = arith.addf %52, %55 : vector<8x32xf32>
    %c3_46 = arith.constant 3 : index
    %c0_47 = arith.constant 0 : index
    %c0_48 = arith.constant 0 : index
    %57 = vector.load %arg7[%c3_46, %c0_47, %c0_48] : memref<4x1x32xf32, #tpu.memory_space<vmem>>, vector<1x1x32xf32>
    %58 = vector.shape_cast %57 : vector<1x1x32xf32> to vector<1x32xf32>
    %59 = vector.broadcast %58 : vector<1x32xf32> to vector<8x32xf32>
    %60 = arith.addf %56, %59 : vector<8x32xf32>
    %cst_49 = arith.constant 5.000000e-01 : f32
    %61 = vector.broadcast %cst_49 : f32 to vector<8x32xf32>
    %62 = arith.mulf %61, %60 : vector<8x32xf32>
    %63 = math.tanh %62 : vector<8x32xf32>
    %cst_50 = arith.constant 1.000000e+00 : f32
    %64 = vector.broadcast %cst_50 : f32 to vector<8x32xf32>
    %65 = arith.addf %63, %64 : vector<8x32xf32>
    %cst_51 = arith.constant 5.000000e-01 : f32
    %66 = vector.broadcast %cst_51 : f32 to vector<8x32xf32>
    %67 = arith.mulf %66, %65 : vector<8x32xf32>
    %c0_52 = arith.constant 0 : index
    %c0_53 = arith.constant 0 : index
    %68 = vector.load %arg4[%c0_52, %c0_53] : memref<8x32xf32, #tpu.memory_space<vmem>>, vector<8x32xf32>
    %69 = arith.mulf %37, %68 : vector<8x32xf32>
    %70 = arith.mulf %19, %49 : vector<8x32xf32>
    %71 = arith.addf %69, %70 : vector<8x32xf32>
    %72 = math.tanh %71 : vector<8x32xf32>
    %73 = arith.mulf %67, %72 : vector<8x32xf32>
    %c0_54 = arith.constant 0 : index
    %c0_55 = arith.constant 0 : index
    %74 = vector.load %arg8[%c0_54, %c0_55] : memref<8x32xf32, #tpu.memory_space<vmem>>, vector<8x32xf32>
    tpu.vector_store %arg8[%c0_54, %c0_55], %73 {strides = array<i32>} : memref<8x32xf32, #tpu.memory_space<vmem>>, vector<8x32xf32>,
    %c0_56 = arith.constant 0 : index
    %c0_57 = arith.constant 0 : index
    %75 = vector.load %arg9[%c0_56, %c0_57] : memref<8x32xf32, #tpu.memory_space<vmem>>, vector<8x32xf32>
    tpu.vector_store %arg9[%c0_56, %c0_57], %71 {strides = array<i32>} : memref<8x32xf32, #tpu.memory_space<vmem>>, vector<8x32xf32>,
    return
  }
  func.func @transform_0(%arg0: i32, %arg1: i32) -> (i32, i32) {
    %c0_i32 = arith.constant 0 : i32
    %c0_i32_0 = arith.constant 0 : i32
    return %arg1, %c0_i32 : i32, i32
  }
  func.func @transform_1(%arg0: i32, %arg1: i32) -> (i32, i32) {
    %c0_i32 = arith.constant 0 : i32
    %c0_i32_0 = arith.constant 0 : i32
    return %arg1, %c0_i32 : i32, i32
  }
  func.func @transform_2(%arg0: i32, %arg1: i32) -> (i32, i32) {
    %c0_i32 = arith.constant 0 : i32
    return %arg1, %arg0 : i32, i32
  }
  func.func @transform_3(%arg0: i32, %arg1: i32) -> (i32, i32, i32) {
    %c0_i32 = arith.constant 0 : i32
    %c0_i32_0 = arith.constant 0 : i32
    %c0_i32_1 = arith.constant 0 : i32
    return %c0_i32, %c0_i32_0, %arg0 : i32, i32, i32
  }
  func.func @transform_4(%arg0: i32, %arg1: i32) -> (i32, i32, i32) {
    %c0_i32 = arith.constant 0 : i32
    %c0_i32_0 = arith.constant 0 : i32
    %c0_i32_1 = arith.constant 0 : i32
    return %c0_i32, %c0_i32_0, %arg0 : i32, i32, i32
  }
  func.func @transform_5(%arg0: i32, %arg1: i32) -> (i32, i32, i32) {
    %c0_i32 = arith.constant 0 : i32
    %c0_i32_0 = arith.constant 0 : i32
    %c0_i32_1 = arith.constant 0 : i32
    return %c0_i32, %c0_i32_0, %arg0 : i32, i32, i32
  }
  func.func @transform_6(%arg0: i32, %arg1: i32) -> (i32, i32) {
    %c0_i32 = arith.constant 0 : i32
    return %arg1, %arg0 : i32, i32
  }
  func.func @transform_7(%arg0: i32, %arg1: i32) -> (i32, i32) {
    %c0_i32 = arith.constant 0 : i32
    return %arg1, %arg0 : i32, i32
  }
}

</mosaic_0001>

<bundles_post_ra>
// kernel: my_lstm_cell_fused.1
= control target key start
LH: loop header
LB: loop body
LE: loop exit
PB: predicated region body
PF: predicated region fallthrough
CT: control target
= control target key end

     0   :  { %13 = vsyncpa [#allocation3], 0  ;;  %s682_s0 = inlined_call_operand.hbm [shape: f32[8,16], index: 0, kind: input, shape index: {}]   ;;  %s683_s1 = inlined_call_operand.hbm [shape: f32[8,32], index: 1, kind: input, shape index: {}]   ;;  %s684_s2 = inlined_call_operand.hbm [shape: f32[8,32], index: 2, kind: input, shape index: {}]   ;;  %s685_s3 = inlined_call_operand.hbm [shape: f32[4,16,32], index: 3, kind: input, shape index: {}]   ;;  %s686_s4 = inlined_call_operand.hbm [shape: f32[4,32,32], index: 4, kind: input, shape index: {}]   ;;  %s687_s5 = inlined_call_operand.vmem [shape: f32[4,1,32], index: 5, kind: input, shape index: {}]   ;;  %s688_s6 = inlined_call_operand.hbm [shape: f32[8,32], index: 6, kind: output, shape index: {0}]   ;;  %s689_s7 = inlined_call_operand.hbm [shape: f32[8,32], index: 7, kind: output, shape index: {1}]  }
   0x1   :  { %14 = vsyncpa [#allocation6], 0 }
   0x2   :  { %15 = vsyncpa [#allocation9], 0 }
   0x3   :  { %16 = vsyncpa [#allocation4], 0  ;;  %s34_s26 = sshll.u32 %s683_s1, 4  ;;  %s35_s26 = int_to_ptr.hbm [resolvable:$true] %s34_s26 }
   0x4   :  { %17 = vsyncpa [#allocation13], 0  ;;  %s590_s27 = smov [#allocation5]   ;;  %s55_s8 = sshll.u32 %s685_s3, 4  ;;  %s56_s8 = int_to_ptr.hbm [resolvable:$true] %s55_s8 }
   0x5   :  { %s36_s28 = sshll.u32 %s590_s27, 4  ;;  %s591_s9 = smov [#allocation8]   ;;  %s37_s28 = int_to_ptr.vmem [resolvable:$true] %s36_s28 }
   0x6   :  { %39 = dma.hbm_to_vmem [thread:$0]  %s35_s26, 128, %s37_s28, [#allocation6]  }
   0x7   :  { %s57_s10 = sshll.u32 %s591_s9, 4  ;;  %s592_s11 = smov 128   ;;  %s58_s10 = int_to_ptr.vmem [resolvable:$true] %s57_s10 }
   0x8   :  { %s593_s12 = smov 8   ;;  %s23_s1 = sshll.u32 %s682_s0, 4  ;;  %s24_s1 = int_to_ptr.hbm [resolvable:$true] %s23_s1 }
   0x9   :  { %63 = dma.hbm_to_vmem [thread:$0]  %s56_s8, 1024, %s58_s10, [#allocation9], %s592_s11, %s592_s11, %s593_s12  }
   0xa   :  { %s594_s15 = smov [#allocation2]   ;;  %s45_s3 = sshll.u32 %s684_s2, 4  ;;  %s46_s3 = int_to_ptr.hbm [resolvable:$true] %s45_s3 }
   0xb   :  { %s25_s16 = sshll.u32 %s594_s15, 4  ;;  %s595_s19 = smov [#allocation7]   ;;  %s26_s16 = int_to_ptr.vmem [resolvable:$true] %s25_s16 }
   0xc   :  { %28 = dma.hbm_to_vmem [thread:$0]  %s24_s1, 128, %s26_s16, [#allocation3]  }
   0xd   :  { %s47_s20 = sshll.u32 %s595_s19, 4  ;;  %s68_s23 = sshll.u32 %s686_s4, 4  ;;  %s48_s20 = int_to_ptr.vmem [resolvable:$true] %s47_s20  ;;  %s69_s23 = int_to_ptr.hbm [resolvable:$true] %s68_s23 }
   0xe   :  { %50 = dma.hbm_to_vmem [thread:$0]  %s46_s3, 128, %s48_s20, [#allocation6]  }
   0xf   :  { %s596_s0 = smov [#allocation10]  }
  0x10   :  { %s70_s24 = sshll.u32 %s596_s0, 4  ;;  %s71_s24 = int_to_ptr.vmem [resolvable:$true] %s70_s24 }
  0x11   :  { %76 = dma.hbm_to_vmem [thread:$0]  %s69_s23, 2048, %s71_s24, [#allocation9], %s592_s11, %s592_s11, %s593_s12  }
  0x12   :  { %580 = dma.done.wait [#allocation3], 128  }
  0x13   :  { %581 = vsyncadd [#allocation3], 4294967168 }
  0x14   :  { %582 = dma.done.wait [#allocation6], 256  }
  0x15   :  { %583 = vsyncadd [#allocation6], 4294967040 }
  0x16   :  { %584 = dma.done.wait [#allocation9], 3072  }
  0x17   :  { %585 = vsyncadd [#allocation9], 4294964224  ;;  %v171_v0 = vld [vmem:[#allocation10 + $0x38] sm:$0xff]  ;;  %v170_v2 = vld [vmem:[#allocation10 + $0x30] sm:$0xff]  ;;  %vm131_vm0 = vcmask 130048   ;;  %vm107_vm1 = vcmask 261120  }
  0x18   :  { %v166_v1 = vld [vmem:[#allocation8 + $0x18] sm:$0xff]  ;;  %184 = vmatpush.msra.mxu2 %v171_v0  ;;  %v165_v3 = vld [vmem:[#allocation8 + $0x10] sm:$0xff]  ;;  %v99_v4 = vld [vmem:[#allocation2] sm:$0xff]  ;;  %s597_s8 = smov [#allocation12]   ;;  %s598_s12 = smov [#allocation11]  }
  0x19   :  { %206 = vmatpush.msra.mxu3 %v166_v1  ;;  %v106_v5 = vld [vmem:[#allocation10 + $0x18] sm:$0xff]  ;;  %v169_v6 = vld [vmem:[#allocation10 + $0x28] sm:$0xff]  ;;  %v105_v8 = vld [vmem:[#allocation10 + $0x10] sm:$0xff]  ;;  %s359_s9 = sshll.u32 %s597_s8, 4  ;;  %s348_s13 = sshll.u32 %s598_s12, 4  ;;  %s360_s9 = int_to_ptr.vmem [resolvable:$true] %s359_s9  ;;  %s349_s13 = int_to_ptr.vmem [resolvable:$true] %s348_s13 }
  0x1a   :  { %123 = vmatpush.msra.mxu0 %v106_v5  ;;  %v224_v7 = vld [vmem:[#allocation8 + $0x28] sm:$0xff]  ;;  %185 = vmatpush.msra.mxu2 %v170_v2  ;;  %v168_v10 = vld [vmem:[#allocation10 + $0x20] sm:$0xff]  ;;  %v100_v13 = vld [vmem:[#allocation5] sm:$0xff]  ;;  %s350_s15 = sshll.u32 %s688_s6, 4  ;;  %s351_s15 = int_to_ptr.hbm [resolvable:$true] %s350_s15 }
  0x1b   :  { %207 = vmatpush.msra.mxu3 %v165_v3  ;;  %v102_v9 = vld [vmem:[#allocation8 + $0x8] sm:$0xff]  ;;  %v223_v12 = vld [vmem:[#allocation8 + $0x20] sm:$0xff]  ;;  %v229_v16 = vld [vmem:[#allocation10 + $0x58] sm:$0xff] }
  0x1c   :  { %381 = vmatmul.msk.f32.vlgmr.msra.gmra.mxu3 %vm131_vm0, %v99_v4  ;;  %124 = vmatpush.msra.mxu0 %v105_v8  ;;  %v104_v11 = vld [vmem:[#allocation10 + $0x8] sm:$0xff]  ;;  %v101_v14 = vld [vmem:[#allocation8] sm:$0xff]  ;;  %v279_v17 = vld [vmem:[#allocation8 + $0x38] sm:$0xff] }
  0x1d   :  { %186 = vmatpush.msra.mxu2 %v169_v6  ;;  %264 = vmatpush.msrb.mxu3 %v224_v7  ;;  %v103_v15 = vld [vmem:[#allocation10] sm:$0xff]  ;;  %v228_v18 = vld [vmem:[#allocation10 + $0x50] sm:$0xff]  ;;  %v284_v20 = vld [vmem:[#allocation10 + $0x78] sm:$0xff] }
  0x1e   :  { %149 = vmatpush.msra.mxu1 %v102_v9  ;;  %125 = vmatpush.msra.mxu0 %v104_v11  ;;  %v278_v19 = vld [vmem:[#allocation8 + $0x30] sm:$0xff]  ;;  %v227_v21 = vld [vmem:[#allocation10 + $0x48] sm:$0xff]  ;;  %v226_v23 = vld [vmem:[#allocation10 + $0x40] sm:$0xff] }
  0x1f   :  { %187 = vmatpush.msra.mxu2 %v168_v10  ;;  %265 = vmatpush.msrb.mxu3 %v223_v12  ;;  %v283_v22 = vld [vmem:[#allocation10 + $0x70] sm:$0xff]  ;;  %v282_v24 = vld [vmem:[#allocation10 + $0x68] sm:$0xff]  ;;  %v281_v25 = vld [vmem:[#allocation10 + $0x60] sm:$0xff] }
  0x20   :  { %380 = vmatmul.msk.f32.vlgmr.msra.gmra.mxu2 %vm107_vm1, %v100_v13  ;;  %150 = vmatpush.msra.mxu1 %v101_v14  ;;  %v398_v28 = vld [vmem:[%s687_s5] ss:$0 sm:$0xff]  ;;  %v399_v31 = vld [vmem:[%s687_s5 + $0x1] ss:$0 sm:$0xff]  ;;  %v400_v38 = vld [vmem:[%s687_s5 + $0x2] ss:$0 sm:$0xff] }
  0x21   :  { %379 = vmatmul.msk.f32.vlgmr.msra.gmra.mxu1 %vm131_vm0, %v99_v4  ;;  %126 = vmatpush.msra.mxu0 %v103_v15  ;;  %v401_v44 = vld [vmem:[%s687_s5 + $0x3] ss:$0 sm:$0xff]  ;;  %v335_v55 = vld [vmem:[#allocation7] sm:$0xff]  ;;  %s361_s5 = sshll.u32 %s689_s7, 4  ;;  %s362_s5 = int_to_ptr.hbm [resolvable:$true] %s361_s5 }
  0x22   :  { %242 = vmatpush.msrb.mxu1 %v229_v16  ;;  %319 = vmatpush.msrb.mxu2 %v279_v17 }
  0x23   :  { %378 = vmatmul.msk.f32.vlgmr.msra.gmra.mxu0 %vm107_vm1, %v100_v13 }
  0x24   :  { %384 = vmatmul.msk.f32.vlgmr.msrb.gmra.mxu3 %vm131_vm0, %v99_v4  ;;  %243 = vmatpush.msrb.mxu1 %v228_v18 }
  0x25   :  { %320 = vmatpush.msrb.mxu2 %v278_v19  ;;  %297 = vmatpush.msrb.mxu0 %v284_v20 }
  0x26   :  { %244 = vmatpush.msrb.mxu1 %v227_v21 }
  0x27   :  { %298 = vmatpush.msrb.mxu0 %v283_v22 }
  0x28   :  { %245 = vmatpush.msrb.mxu1 %v226_v23  ;;  %387 = vmatmul.msk.f32.vlgmr.msrb.gmra.mxu2 %vm131_vm0, %v99_v4 }
  0x29   :  { %383 = vmatmul.msk.f32.vlgmr.msrb.gmra.mxu1 %vm107_vm1, %v100_v13  ;;  %299 = vmatpush.msrb.mxu0 %v282_v24 }
  0x2b   :  { %300 = vmatpush.msrb.mxu0 %v281_v25 }
  0x2c   :  { %386 = vmatmul.msk.f32.vlgmr.msrb.gmra.mxu0 %vm107_vm1, %v100_v13 }
  0x9e   :  { %v152_v26 = vpop.f32.mrf.mxu1 }
  0x9f   :  { %v209_v27 = vpop.f32.mrf.mxu3 }
  0xa0   :  { %v128_v29 = vpop.f32.mrf.mxu0 }
  0xa1   :  { %v153_v30 = vadd.f32 %v152_v26, %v128_v29 }
  0xa3   :  { %v159_v32 = vadd.f32 %v398_v28, %v153_v30  ;;  %v189_v33 = vpop.f32.mrf.mxu2 }
  0xa4   :  { %v210_v34 = vadd.f32 %v209_v27, %v189_v33 }
  0xa5   :  { %v160_v35 = vmul.f32 0.5, %v159_v32 }
  0xa6   :  { %v217_v36 = vadd.f32 %v399_v31, %v210_v34  ;;  %v247_v37 = vpop.f32.mrf.mxu1 }
  0xa7   :  { %402 = vtanh.f32 %v160_v35  ;;  %v267_v39 = vpop.f32.mrf.mxu3 }
  0xa8   :  { %v218_v40 = vmul.f32 0.5, %v217_v36  ;;  %v268_v41 = vadd.f32 %v267_v39, %v247_v37 }
  0xa9   :  { %v302_v42 = vpop.f32.mrf.mxu0 }
  0xaa   :  { %404 = vtanh.f32 %v218_v40  ;;  %v275_v43 = vadd.f32 %v400_v38, %v268_v41 }
  0xab   :  { %v322_v45 = vpop.f32.mrf.mxu2 }
  0xac   :  { %406 = vtanh.f32 %v275_v43  ;;  %v323_v46 = vadd.f32 %v322_v45, %v302_v42 }
  0xad   :  { %v403_v47 = vpop.eup %402 }
  0xae   :  { %v162_v48 = vadd.f32 1.0, %v403_v47  ;;  %v330_v49 = vadd.f32 %v401_v44, %v323_v46 }
  0xb0   :  { %v405_v50 = vpop.eup %404  ;;  %v331_v51 = vmul.f32 0.5, %v330_v49  ;;  %v163_v52 = vmul.f32 0.5, %v162_v48 }
  0xb1   :  { %v220_v53 = vadd.f32 1.0, %v405_v50 }
  0xb2   :  { %v407_v54 = vpop.eup %406  ;;  %408 = vtanh.f32 %v331_v51 }
  0xb3   :  { %v221_v56 = vmul.f32 0.5, %v220_v53  ;;  %v337_v58 = vmul.f32 %v407_v54, %v163_v52 }
  0xb5   :  { %v336_v57 = vmul.f32 %v335_v55, %v221_v56 }
  0xb7   :  { %v338_v59 = vadd.f32 %v337_v58, %v336_v57 }
  0xb8   :  { %v409_v60 = vpop.eup %408 }
  0xb9   :  { %410 = vtanh.f32 %v338_v59  ;;  %342 = vst.msk [vmem:[#allocation12] sm:$0xff] %vm107_vm1, %v338_v59  ;;  %v333_v61 = vadd.f32 1.0, %v409_v60 }
  0xba   :  { %364 = dma.vmem_to_hbm [thread:$0]  %s360_s9, 128, %s362_s5, [#allocation13]  }
  0xbb   :  { %v334_v62 = vmul.f32 0.5, %v333_v61 }
  0xbf   :  { %v411_v63 = vpop.eup %410 }
  0xc0   :  { %v340_v0 = vmul.f32 %v411_v63, %v334_v62 }
  0xc2   :  { %341 = vst.msk [vmem:[#allocation11] sm:$0xff] %vm107_vm1, %v340_v0 }
  0xc3   :  { %353 = dma.vmem_to_hbm [thread:$0]  %s349_s13, 128, %s351_s15, [#allocation4]  }
  0xc4   :  { %586 = dma.done.wait [#allocation4], 128  }
  0xc5   :  { %587 = vsyncadd [#allocation4], 4294967168 }
  0xc6   :  { %588 = dma.done.wait [#allocation13], 128  }
  0xc7   :  { %589 = vsyncadd [#allocation13], 4294967168 }
  0xc8   :  { %373 = vsyncpa [#allocation3], 1 }
  0xc9   :  { %374 = vsyncpa [#allocation6], 1 }
  0xca   :  { %375 = vsyncpa [#allocation9], 1 }
  0xcb   :  { %376 = vsyncpa [#allocation4], 1 }
  0xcc   :  { %377 = vsyncpa [#allocation13], 1 }

</bundles_post_ra>
